<compile_context>
chip_gen: v7x
topology: tpu7x:2x2x1
jax: 0.10.0
libtpu: 0.0.40
codegen_flags: <defaults>
</compile_context>

<pallas_src>
import jax
import jax.numpy as jnp
from jax import lax
from jax.experimental import pallas as pl
from jax.experimental.pallas import tpu as pltpu


def _round_up(x, m):
    return ((x + m - 1) // m) * m


def linear_kernel(x_ref, w_ref, b_ref, o_ref, acc_ref):
    # x_ref: (tm, tk), w_ref: (tn, tk)  [PyTorch (out_fea, in_fea) layout],
    # b_ref: (1, tn),  o_ref: (tm, tn), acc_ref: f32 (tm, tn) scratch.
    k = pl.program_id(2)

    @pl.when(k == 0)
    def _():
        acc_ref[...] = jnp.zeros_like(acc_ref)

    # Contract x's feature axis with weight's feature axis; the MXU takes the
    # transposed contraction for free (no wrapper-side weight.T / HBM copy).
    acc_ref[...] += lax.dot_general(
        x_ref[...], w_ref[...],
        dimension_numbers=(((1,), (1,)), ((), ())),
        preferred_element_type=jnp.float32)

    @pl.when(k == pl.num_programs(2) - 1)
    def _():
        o_ref[...] = (acc_ref[...] + b_ref[...].astype(jnp.float32)).astype(o_ref.dtype)


def linear_forward(x, weight, bias, *, tm=256, tn=256, tk=512):
    """y = x @ weight.T + bias  (nn.Linear semantics).

    x: (B, in_fea) or (in_fea,);  weight: (out_fea, in_fea);  bias: (out_fea,)
    tm/tn/tk are max tile sizes (clamped to the padded problem).
    """
    squeeze = (x.ndim == 1)
    if squeeze:
        x = x[None, :]

    B, in_fea = x.shape
    out_fea, in_fea_w = weight.shape
    assert in_fea == in_fea_w, "weight must be (out_fea, in_fea)"

    # Clamp tile sizes to the padded problem; keep (8, 128) alignment.
    tm = min(tm, _round_up(B, 8))
    tn = min(tn, _round_up(out_fea, 128))
    tk = min(tk, _round_up(in_fea, 128))

    Mp = _round_up(B, tm)
    Np = _round_up(out_fea, tn)
    Kp = _round_up(in_fea, tk)

    # Zero-pad to tile multiples (zeros contribute nothing to the matmul and
    # keep the output lane dimension dense / >= 128).
    x_p = x if (Mp, Kp) == (B, in_fea) else jnp.pad(
        x, ((0, Mp - B), (0, Kp - in_fea)))
    w_p = weight if (Np, Kp) == (out_fea, in_fea) else jnp.pad(
        weight, ((0, Np - out_fea), (0, Kp - in_fea)))
    b_p = bias.reshape(1, out_fea)
    if Np != out_fea:
        b_p = jnp.pad(b_p, ((0, 0), (0, Np - out_fea)))

    grid = (Mp // tm, Np // tn, Kp // tk)

    out = pl.pallas_call(
        linear_kernel,
        out_shape=jax.ShapeDtypeStruct((Mp, Np), x.dtype),
        grid_spec=pltpu.PrefetchScalarGridSpec(
            num_scalar_prefetch=0,
            grid=grid,
            in_specs=[
                pl.BlockSpec((tm, tk), lambda i, j, k: (i, k)),   # x tile
                pl.BlockSpec((tn, tk), lambda i, j, k: (j, k)),   # weight tile
                pl.BlockSpec((1, tn), lambda i, j, k: (0, j)),    # bias tile
            ],
            out_specs=pl.BlockSpec((tm, tn), lambda i, j, k: (i, j)),
            scratch_shapes=[pltpu.VMEM((tm, tn), jnp.float32)],
        ),
        compiler_params=pltpu.CompilerParams(
            dimension_semantics=("parallel", "parallel", "arbitrary")),
    )(x_p, w_p, b_p)

    out = out[:B, :out_fea]
    if squeeze:
        out = out[0]
    return out


if __name__ == "__main__":
    # Shapes consistent with the spec (x = torch.rand(512) -> in_fea = 512).
    B, in_fea, out_fea = 16, 512, 128

    key = jax.random.PRNGKey(0)
    kx, kx1, kw, kb = jax.random.split(key, 4)

    x = jax.random.uniform(kx, (B, in_fea), dtype=jnp.float32)
    x1d = jax.random.uniform(kx1, (in_fea,), dtype=jnp.float32)  # rank-1, like the demo
    bound = 1.0 / jnp.sqrt(jnp.float32(in_fea))
    weight = jax.random.uniform(kw, (out_fea, in_fea), dtype=jnp.float32,
                                minval=-bound, maxval=bound)
    bias = jax.random.uniform(kb, (out_fea,), dtype=jnp.float32,
                              minval=-bound, maxval=bound)

    # tk=128 exercises the multi-step K reduction / accumulator path.
    y = linear_forward(x, weight, bias, tk=128)
    y = jax.block_until_ready(y)
    y_ref = x @ weight.T + bias
    assert y.shape == (B, out_fea)
    assert jnp.allclose(y, y_ref, atol=1e-5, rtol=1e-5)

    # Rank-1 input path (mirrors `x = torch.rand(512)` in the PyTorch spec).
    y1 = jax.block_until_ready(linear_forward(x1d, weight, bias))
    y1_ref = x1d @ weight.T + bias
    assert y1.shape == (out_fea,)
    assert jnp.allclose(y1, y1_ref, atol=1e-5, rtol=1e-5)

    print("KERNEL_OK")
</pallas_src>

<mosaic_0001>
module attributes {stable_mosaic.version = 11 : i64} {
  func.func @linear_kernel(%arg0: i32, %arg1: i32, %arg2: i32, %arg3: memref<16x128xf32, #tpu.memory_space<vmem>>, %arg4: memref<128x128xf32, #tpu.memory_space<vmem>>, %arg5: memref<1x128xf32, #tpu.memory_space<vmem>>, %arg6: memref<16x128xf32, #tpu.memory_space<vmem>>, %arg7: memref<16x128xf32, #tpu.memory_space<vmem>>) attributes {dimension_semantics = [#tpu.dimension_semantics<parallel>, #tpu.dimension_semantics<parallel>, #tpu.dimension_semantics<arbitrary>], iteration_bounds = array<i64: 1, 1, 4>, scalar_prefetch = 0 : i64, scratch_operands = 1 : i64, tpu.core_type = #tpu.core_type<tc>, window_params = [{transform_indices = @transform_0, window_bounds = array<i64: 16, 128>}, {transform_indices = @transform_1, window_bounds = array<i64: 128, 128>}, {transform_indices = @transform_2, window_bounds = array<i64: 1, 128>}, {transform_indices = @transform_3, window_bounds = array<i64: 16, 128>}]} {
    %c0_i32 = arith.constant 0 : i32
    %0 = arith.cmpi eq, %arg2, %c0_i32 : i32
    %1 = arith.extui %0 : i1 to i32
    %c0_i32_0 = arith.constant 0 : i32
    %2 = arith.cmpi ne, %1, %c0_i32_0 : i32
    scf.if %2 {
      %cst_9 = arith.constant 0.000000e+00 : f32
      %12 = vector.broadcast %cst_9 : f32 to vector<16x128xf32>
      %c0_10 = arith.constant 0 : index
      %c0_11 = arith.constant 0 : index
      %13 = vector.load %arg7[%c0_10, %c0_11] : memref<16x128xf32, #tpu.memory_space<vmem>>, vector<16x128xf32>
      tpu.vector_store %arg7[%c0_10, %c0_11], %12 {strides = array<i32>} : memref<16x128xf32, #tpu.memory_space<vmem>>, vector<16x128xf32>,
    } else {
    }
    %c0 = arith.constant 0 : index
    %c0_1 = arith.constant 0 : index
    %3 = vector.load %arg7[%c0, %c0_1] : memref<16x128xf32, #tpu.memory_space<vmem>>, vector<16x128xf32>
    %c0_2 = arith.constant 0 : index
    %c0_3 = arith.constant 0 : index
    %4 = vector.load %arg3[%c0_2, %c0_3] : memref<16x128xf32, #tpu.memory_space<vmem>>, vector<16x128xf32>
    %c0_4 = arith.constant 0 : index
    %c0_5 = arith.constant 0 : index
    %5 = vector.load %arg4[%c0_4, %c0_5] : memref<128x128xf32, #tpu.memory_space<vmem>>, vector<128x128xf32>
    %cst = arith.constant dense<0.000000e+00> : vector<16x128xf32>
    %6 = tpu.matmul %4, %5, %cst {dimension_numbers = #tpu.dot_dimension_numbers<[1], [1], [0], [0], [0, 0, 1, 0], [], []>} : vector<16x128xf32>, vector<128x128xf32>, vector<16x128xf32> -> vector<16x128xf32>
    %7 = arith.addf %3, %6 : vector<16x128xf32>
    %c0_6 = arith.constant 0 : index
    %c0_7 = arith.constant 0 : index
    %8 = vector.load %arg7[%c0_6, %c0_7] : memref<16x128xf32, #tpu.memory_space<vmem>>, vector<16x128xf32>
    tpu.vector_store %arg7[%c0_6, %c0_7], %7 {strides = array<i32>} : memref<16x128xf32, #tpu.memory_space<vmem>>, vector<16x128xf32>,
    %c3_i32 = arith.constant 3 : i32
    %9 = arith.cmpi eq, %arg2, %c3_i32 : i32
    %10 = arith.extui %9 : i1 to i32
    %c0_i32_8 = arith.constant 0 : i32
    %11 = arith.cmpi ne, %10, %c0_i32_8 : i32
    scf.if %11 {
      %c0_9 = arith.constant 0 : index
      %c0_10 = arith.constant 0 : index
      %12 = vector.load %arg7[%c0_9, %c0_10] : memref<16x128xf32, #tpu.memory_space<vmem>>, vector<16x128xf32>
      %c0_11 = arith.constant 0 : index
      %c0_12 = arith.constant 0 : index
      %13 = vector.load %arg5[%c0_11, %c0_12] : memref<1x128xf32, #tpu.memory_space<vmem>>, vector<1x128xf32>
      %14 = vector.broadcast %13 : vector<1x128xf32> to vector<16x128xf32>
      %15 = arith.addf %12, %14 : vector<16x128xf32>
      %c0_13 = arith.constant 0 : index
      %c0_14 = arith.constant 0 : index
      %16 = vector.load %arg6[%c0_13, %c0_14] : memref<16x128xf32, #tpu.memory_space<vmem>>, vector<16x128xf32>
      tpu.vector_store %arg6[%c0_13, %c0_14], %15 {strides = array<i32>} : memref<16x128xf32, #tpu.memory_space<vmem>>, vector<16x128xf32>,
    } else {
    }
    return
  }
  func.func @transform_0(%arg0: i32, %arg1: i32, %arg2: i32) -> (i32, i32) {
    %c0_i32 = arith.constant 0 : i32
    return %arg0, %arg2 : i32, i32
  }
  func.func @transform_1(%arg0: i32, %arg1: i32, %arg2: i32) -> (i32, i32) {
    %c0_i32 = arith.constant 0 : i32
    return %arg1, %arg2 : i32, i32
  }
  func.func @transform_2(%arg0: i32, %arg1: i32, %arg2: i32) -> (i32, i32) {
    %c0_i32 = arith.constant 0 : i32
    %c0_i32_0 = arith.constant 0 : i32
    return %c0_i32, %arg1 : i32, i32
  }
  func.func @transform_3(%arg0: i32, %arg1: i32, %arg2: i32) -> (i32, i32) {
    %c0_i32 = arith.constant 0 : i32
    return %arg0, %arg1 : i32, i32
  }
}

</mosaic_0001>

<bundles_post_ra>
// kernel: tpu_custom_call.1
= control target key start
LH: loop header
LB: loop body
LE: loop exit
PB: predicated region body
PF: predicated region fallthrough
CT: control target
= control target key end

     0   :  { %8 = vsyncpa [#allocation4], 0  ;;  %s1094_s0 = inlined_call_operand.hbm [shape: f32[16,512], index: 0, kind: input, shape index: {}]   ;;  %s1095_s1 = inlined_call_operand.hbm [shape: f32[128,512], index: 1, kind: input, shape index: {}]   ;;  %s1096_s2 = inlined_call_operand.vmem [shape: f32[1,128], index: 2, kind: input, shape index: {}]   ;;  %s1097_s3 = inlined_call_operand.hbm [shape: f32[16,128], index: 3, kind: output, shape index: {}]  }
   0x1   :  { %10 = vsyncpa [#allocation4 + $0x1], 0 }
   0x2   :  { %11 = vsyncpa [#allocation7], 0 }
   0x3   :  { %13 = vsyncpa [#allocation7 + $0x1], 0 }
   0x4   :  { %14 = vsyncpa [#allocation5], 0  ;;  %s859_s12 = smov 0   ;;  %s861_s13 = smov 0  }
   0x5   :  { %s863_s14 = smov 0   ;;  %s865_s15 = smov 0  }
   0x6   :  { %s867_s16 = smov 0   ;;  %s869_s17 = smov 0  }
   0x7 LB: > { %s508_s18 = sadd.s32 4294967295, %s828_s17   ;;  %s32_s19 = sadd.s32 1, %s824_s16  ;;  %s828_s17 = sphi %s869_s17, %s20_s17   ;;  %s824_s16 = sphi %s867_s16, %s1110_s16   ;;  %s820_s15 = sphi %s865_s15, %s1109_s15   ;;  %s816_s14 = sphi %s863_s14, %s1108_s14   ;;  %s812_s13 = sphi %s861_s13, %s1107_s13   ;;  %s808_s12 = sphi %s859_s12, %s1106_s12  }
   0x8   : > { %p33_p0 = scmp.ge.s32.totalorder %s32_s19, 4  ;;  %s48_s20 = sadd.s32 1, %s816_s14 }
   0x9   : > { %p55_p1 = scmp.ne.s32.totalorder %s816_s14, %s812_s13  ;;  %p56_p2 = scmp.eq.s32.totalorder %s828_s17, 0 }
   0xa   : > { %s1112_s19 = smov (%p33_p0, %s32_s19), 0  ;;  %p61_p4 = scmp.ne.s32.totalorder %s812_s13, %s808_s12 }
   0xb   : > { %p895_p3 = por %p56_p2, %p55_p1  ;;  %s44_s22 = ssub.s32 %s824_s16, %s1112_s19 }
   0xc   : > { %p62_p5 = scmp.eq.s32.totalorder %s508_s18, 0  ;;  %p46_p6 = scmp.eq.s32.totalorder %s44_s22, 0 }
   0xd   : > { %p626_p8 = scmp.lt.s32.totalorder %s828_s17, 4  ;;  %s913_s25 = sand.u32 1, %s816_s14  }
   0xe   : > { %p904_p7 = por %p62_p5, %p61_p4  ;;  %s513_s26 = sshll.u32 %s824_s16, 7 }
   0xf   : > { %s910_s24 = scalar_select %p46_p6, %s816_s14, %s48_s20  }
  0x10   : > { %s1100_s23 = scalar_select %p904_p7, 1, 0 }
  0x11   : > { %s512_s27 = sshll.u32 %s913_s25, 4  ;;  %s922_s30 = scalar_lea.hbm %s1094_s0, %s513_s26 }
  0x12   : > { %s177_s4 = scalar_lea.vmem [#allocation3], %s512_s27  ;;  %p926_p9 = pnand %p626_p8, %p895_p3 }
  0x13   : > { %s186_s5 = sshll.u32 %s177_s4, 4  ;;  %s174_s7 = scalar_lea.sflag [#allocation4], %s913_s25  ;;  %s930_s5 = int_to_ptr.vmem [resolvable:$true] %s186_s5 }
  0x14   : > { %s684_s8 = scalar_lea.hbm %s922_s30, 256  ;;  %p686_p12 = pneg %p926_p9 }
  0x15   : > { %p685_p11 = scmp.ne.s32.totalorder %s922_s30, %s684_s8  ;;  %s689_s11 = scalar_lea.hbm %s1094_s0, 1024 }
  0x16   : > { %p690_p1 = scmp.lt.u32.totalorder %s922_s30, %s1094_s0  ;;  %p691_p2 = scmp.lt.u32.totalorder %s689_s11, %s684_s8 }
  0x17   : > { %p687_p13 = pnand %p686_p12, %p685_p11  ;;  %p693_p4 = scmp.lt.u32.totalorder %s684_s8, %s922_s30 }
  0x18   : > { %p692_p3 = por %p691_p2, %p690_p1 }
  0x19   : > { %p688_p0 = pneg %p687_p13 }
  0x1a   : > { %p694_p5 = por %p693_p4, %p692_p3 }
  0x1c   : > { %p695_p6 = pnand %p694_p5, %p688_p0 }
  0x1e   : > { %698 = shalt.err (!%p695_p6)
}
  0x1f   : > { %s699_s21 = scalar_lea.vmem %s930_s5, 256  ;;  %s830_s22 = smov [#allocation3]  }
  0x20   : > { %p700_p8 = scmp.ne.s32.totalorder %s930_s5, %s699_s21  ;;  %s704_s27 = sshll.u32 %s830_s22, 4  ;;  %s705_s27 = int_to_ptr.vmem [resolvable:$false] %s704_s27 }
  0x21   : > { %s706_s28 = scalar_lea.vmem %s705_s27, 512  ;;  %p707_p10 = scmp.lt.s32.totalorder %s930_s5, %s705_s27 }
  0x22   : > { %p702_p11 = pnand %p700_p8, %p686_p12  ;;  %p708_p1 = scmp.lt.s32.totalorder %s706_s28, %s699_s21 }
  0x24   : > { %p703_p13 = pneg %p702_p11  ;;  %p709_p2 = por %p708_p1, %p707_p10 }
  0x26   : > { %p710_p3 = pnand %p709_p2, %p703_p13 }
  0x28   : > { %713 = shalt.err (!%p710_p3)
}
  0x29   : > { %s831_s29 = smov 512   ;;  %s832_s4 = smov 128  }
  0x2a   : > { %s833_s8 = smov 8   ;;  %p217_p10 = scmp.lt.s32.totalorder %s828_s17, 5 }
  0x2b   : > { %622 = dma.hbm_to_vmem [thread:$0]  (!%p926_p9), %s922_s30, 256, %s930_s5, %s174_s7, %s831_s29, %s832_s4, %s833_s8  }
  0x2c   : > { %s514_s9 = sshll.u32 %s913_s25, 7  ;;  %s971_s12 = scalar_lea.hbm %s1095_s1, %s513_s26 }
  0x2d   : > { %p1102_p0 = scmp.ge.s32.totalorder %s828_s17, 1  ;;  %s200_s21 = scalar_lea.vmem [#allocation6], %s514_s9 }
  0x2e   : > { %s209_s22 = sshll.u32 %s200_s21, 4  ;;  %s197_s30 = scalar_lea.sflag [#allocation7], %s913_s25  ;;  %s979_s22 = int_to_ptr.vmem [resolvable:$true] %s209_s22 }
  0x2f   : > { %p975_p4 = pnand %p1102_p0, %p217_p10  ;;  %s714_s5 = scalar_lea.hbm %s971_s12, 2048 }
  0x30   : > { %p715_p5 = scmp.ne.s32.totalorder %s971_s12, %s714_s5  ;;  %s719_s27 = scalar_lea.hbm %s1095_s1, 8192 }
  0x31   : > { %p720_p11 = scmp.lt.u32.totalorder %s971_s12, %s1095_s1  ;;  %p721_p13 = scmp.lt.u32.totalorder %s719_s27, %s714_s5 }
  0x32   : > { %p717_p6 = pnand %p715_p5, %p686_p12  ;;  %p723_p2 = scmp.lt.u32.totalorder %s714_s5, %s971_s12 }
  0x33   : > { %p722_p1 = por %p721_p13, %p720_p11 }
  0x34   : > { %p718_p8 = pneg %p717_p6 }
  0x35   : > { %p724_p3 = por %p723_p2, %p722_p1 }
  0x37   : > { %p725_p10 = pnand %p724_p3, %p718_p8 }
  0x39   : > { %728 = shalt.err (!%p725_p10)
}
  0x3a   : > { %s729_s9 = scalar_lea.vmem %s979_s22, 2048  ;;  %s834_s11 = smov [#allocation6]  }
  0x3b   : > { %p730_p0 = scmp.ne.s32.totalorder %s979_s22, %s729_s9  ;;  %s734_s21 = sshll.u32 %s834_s11, 4  ;;  %s735_s21 = int_to_ptr.vmem [resolvable:$false] %s734_s21 }
  0x3c   : > { %s736_s26 = scalar_lea.vmem %s735_s21, 4096  ;;  %p737_p7 = scmp.lt.s32.totalorder %s979_s22, %s735_s21 }
  0x3d   : > { %p732_p5 = pnand %p730_p0, %p686_p12  ;;  %p738_p11 = scmp.lt.s32.totalorder %s736_s26, %s729_s9 }
  0x3f   : > { %p733_p6 = pneg %p732_p5  ;;  %p739_p13 = por %p738_p11, %p737_p7 }
  0x41   : > { %p740_p1 = pnand %p739_p13, %p733_p6 }
  0x43   : > { %743 = shalt.err (!%p740_p1)
}
  0x44   : > { %625 = dma.hbm_to_vmem [thread:$0]  (!%p926_p9), %s971_s12, 2048, %s979_s22, %s197_s30, %s831_s29, %s832_s4, %s833_s8  }
  0x45   : > { %221 = sbr.rel (%p975_p4) target bundleno = 408 (0x198), region = 32  ;;  %s223_s5 = sand.u32 (!%p975_p4), 1, %s812_s13  }
  0x46   : > { %s517_s7 = sshll.u32 (!%p975_p4), %s223_s5, 4  ;;  %s224_s27 = scalar_lea.sflag (!%p975_p4), [#allocation4], %s223_s5 }
  0x47   : > { %s1013_s28 = scalar_lea.vmem (!%p975_p4), [#allocation3], %s517_s7  ;;  %p1104_p7 = scmp.ne.s32.totalorder (!%p975_p4), %s1100_s23, 0 }
  0x4c   : > { %795 = dma.done.wait (%p1104_p7), %s224_s27, 256  }
  0x4d   : > { %797 = vsyncadd (%p1104_p7), %s224_s27, 4294967040  ;;  %s518_s25 = sshll.u32 %s223_s5, 7  ;;  %s233_s6 = scalar_lea.sflag [#allocation7], %s223_s5 }
  0x4e   : > { %s1019_s10 = scalar_lea.vmem [#allocation6], %s518_s25 }
  0x4f   : > { %799 = dma.done.wait (%p1104_p7), %s233_s6, 2048  }
  0x50   : > { %801 = vsyncadd (%p1104_p7), %s233_s6, 4294965248  ;;  %p519_p9 = scmp.ne.s32.totalorder %s820_s15, 0 }
  0x51   : > { %v835_v0 = vmov (!%p519_p9), 0.0  }
  0x52   : > { %271 = sbr.rel (%p519_p9) target bundleno = 89 (0x59), region = 44  ;;  %272 = vst [vmem:[#allocation2] sm:$0xff] (!%p519_p9), %v835_v0  ;;  %273 = vst [vmem:[#allocation2 + $0x8] sm:$0xff] (!%p519_p9), %v835_v0 }
  0x59 PF: > { %v278_v1 = vld [vmem:[%s1019_s10] sm:$0xff]  ;;  %v279_v2 = vld [vmem:[%s1019_s10 + $0x8] sm:$0xff]  ;;  %v280_v3 = vld [vmem:[%s1019_s10 + $0x10] sm:$0xff]  ;;  %p520_p12 = scmp.ne.s32.totalorder %s820_s15, 3 }
  0x5a   : > { %v579_v4 = vpack.c.bf16 %v279_v2, %v278_v1  ;;  %v281_v5 = vld [vmem:[%s1019_s10 + $0x18] sm:$0xff]  ;;  %v276_v7 = vld [vmem:[%s1013_s28] sm:$0xff]  ;;  %v283_v9 = vld [vmem:[%s1019_s10 + $0x28] sm:$0xff] }
  0x5b   : > { %v583_v6 = vpack.c.bf16 %v281_v5, %v280_v3  ;;  %v282_v8 = vld [vmem:[%s1019_s10 + $0x20] sm:$0xff]  ;;  %576 = vmatprep.mubr.f32.mxu0 %v276_v7  ;;  %v284_v11 = vld [vmem:[%s1019_s10 + $0x30] sm:$0xff]  ;;  %v285_v12 = vld [vmem:[%s1019_s10 + $0x38] sm:$0xff] }
  0x5c   : > { %580 = vmatprep.subr.bf16.mxu0 %v579_v4  ;;  %v587_v10 = vpack.c.bf16 %v283_v9, %v282_v8  ;;  %v591_v13 = vpack.c.bf16 %v285_v12, %v284_v11  ;;  %v286_v14 = vld [vmem:[%s1019_s10 + $0x40] sm:$0xff]  ;;  %v287_v15 = vld [vmem:[%s1019_s10 + $0x48] sm:$0xff]  ;;  %v288_v17 = vld [vmem:[%s1019_s10 + $0x50] sm:$0xff] }
  0x5d   : > { %582 = vmatpush3.bf16.xpose.msra.mxu0 %v579_v4  ;;  %v595_v16 = vpack.c.bf16 %v287_v15, %v286_v14  ;;  %v289_v18 = vld [vmem:[%s1019_s10 + $0x58] sm:$0xff]  ;;  %v290_v20 = vld [vmem:[%s1019_s10 + $0x60] sm:$0xff]  ;;  %v291_v21 = vld [vmem:[%s1019_s10 + $0x68] sm:$0xff] }
  0x5e   : > { %584 = vmatprep.subr.bf16.mxu0 %v583_v6  ;;  %v599_v19 = vpack.c.bf16 %v289_v18, %v288_v17  ;;  %v603_v22 = vpack.c.bf16 %v291_v21, %v290_v20  ;;  %v292_v23 = vld [vmem:[%s1019_s10 + $0x70] sm:$0xff]  ;;  %v293_v24 = vld [vmem:[%s1019_s10 + $0x78] sm:$0xff] }
  0x5f   : > { %v607_v25 = vpack.c.bf16 %v293_v24, %v292_v23  ;;  %v277_v26 = vld [vmem:[%s1013_s28 + $0x8] sm:$0xff]  ;;  %v274_v28 = vld [vmem:[#allocation2] sm:$0xff] }
  0x60   : > { %v275_v27 = vld [vmem:[#allocation2 + $0x8] sm:$0xff]  ;;  %v521_v34 = vld [vmem:[%s1096_s2] ss:$0 sm:$0xff] (!%p520_p12) }
  0x65   : > { %586 = vmatpush3.bf16.xpose.msra.mxu0 %v583_v6 }
  0x66   : > { %588 = vmatprep.subr.bf16.mxu0 %v587_v10 }
  0x6d   : > { %590 = vmatpush3.bf16.xpose.msra.mxu0 %v587_v10 }
  0x6e   : > { %592 = vmatprep.subr.bf16.mxu0 %v591_v13 }
  0x75   : > { %594 = vmatpush3.bf16.xpose.msra.mxu0 %v591_v13 }
  0x76   : > { %596 = vmatprep.subr.bf16.mxu0 %v595_v16 }
  0x7d   : > { %598 = vmatpush3.bf16.xpose.msra.mxu0 %v595_v16 }
  0x7e   : > { %600 = vmatprep.subr.bf16.mxu0 %v599_v19 }
  0x85   : > { %602 = vmatpush3.bf16.xpose.msra.mxu0 %v599_v19 }
  0x86   : > { %604 = vmatprep.subr.bf16.mxu0 %v603_v22 }
  0x8d   : > { %606 = vmatpush3.bf16.xpose.msra.mxu0 %v603_v22 }
  0x8e   : > { %608 = vmatprep.subr.bf16.mxu0 %v607_v25 }
  0x95   : > { %610 = vmatpush3.bf16.xpose.msra.mxu0 %v607_v25 }
  0x9c   : > { %577 = vmatmul.mubr.f32.vlgmr.msra.gmra.mrb[0].mxu0 %v277_v26 }
 0x16d   : > { %376 = sbr.rel (%p520_p12) target bundleno = 382 (0x17e), region = 48 }
 0x16f   : > { %v578_v29 = vpop.f32.mrb[0].mxu0 }
 0x170   : > { %v370_v30 = vadd.f32 %v578_v29, %v275_v27  ;;  %v360_v31 = vpop.f32.mrb[1].mxu0 }
 0x171   : > { %v369_v32 = vadd.f32 %v360_v31, %v274_v28 }
 0x172   : > { %372 = vst [vmem:[#allocation2 + $0x8] sm:$0xff] %v370_v30 }
 0x173   : > { %371 = vst [vmem:[#allocation2] sm:$0xff] %v369_v32 }
 0x179   : > { %v378_v35 = vld [vmem:[#allocation2 + $0x8] sm:$0xff] }
 0x17a   : > { %v377_v33 = vld [vmem:[#allocation2] sm:$0xff]  ;;  %v387_v37 = vadd.f32 %v521_v34, %v378_v35 }
 0x17b   : > { %v386_v36 = vadd.f32 %v521_v34, %v377_v33 }
 0x17c   : > { %389 = vst [vmem:[#allocation8 + $0x8] sm:$0xff] %v387_v37 }
 0x17d   : > { %388 = vst [vmem:[#allocation8] sm:$0xff] %v386_v36 }
 0x17e PF: > { %p1050_p4 = scmp.eq.s32.totalorder %s508_s18, 3  ;;  %s836_s15 = smov [#allocation8]  }
 0x17f   : > { %s400_s8 = sshll.u32 %s836_s15, 4  ;;  %s401_s8 = int_to_ptr.vmem [resolvable:$true] %s400_s8 }
 0x180   : > { %s744_s12 = scalar_lea.vmem %s401_s8, 256  ;;  %p751_p10 = scmp.lt.s32.totalorder %s401_s8, %s401_s8 }
 0x181   : > { %p745_p8 = scmp.ne.s32.totalorder %s401_s8, %s744_s12  ;;  %p752_p0 = scmp.lt.s32.totalorder %s744_s12, %s744_s12 }
 0x183   : > { %p746_p2 = pnand %p745_p8, %p1050_p4  ;;  %p753_p5 = por %p752_p0, %p751_p10 }
 0x185   : > { %p747_p3 = pneg %p746_p2 }
 0x187   : > { %p754_p6 = pnand %p753_p5, %p747_p3 }
 0x189   : > { %757 = shalt.err (!%p754_p6)
}
 0x18a   : > { %s758_s18 = scalar_lea.hbm %s1097_s3, 256 }
 0x18b   : > { %p759_p11 = scmp.ne.s32.totalorder %s1097_s3, %s758_s18  ;;  %p764_p7 = scmp.lt.u32.totalorder %s758_s18, %s1097_s3 }
 0x18d   : > { %p760_p13 = pnand %p759_p11, %p1050_p4 }
 0x18f   : > { %p761_p1 = pneg %p760_p13 }
 0x191   : > { %p766_p9 = pnand %p764_p7, %p761_p1 }
 0x193   : > { %769 = shalt.err (!%p766_p9)
}
 0x194   : > { %s837_s26 = smov 128   ;;  %s838_s5 = smov 8  }
 0x195   : > { %616 = dma.vmem_to_hbm [thread:$0]  (%p1050_p4), %s401_s8, 256, %s1097_s3, [#allocation5], %s837_s26, %s837_s26, %s838_s5  }
 0x196   : > { %803 = dma.done.wait (%p1050_p4), [#allocation5], 256  }
 0x197   : > { %805 = vsyncadd (%p1050_p4), [#allocation5], 4294967040 }
 0x198 PF: > { %s20_s17 = sadd.s32 1, %s828_s17   ;;  %s1106_s12 = smov %s812_s13 }
 0x199   : > { %p17_p12 = scmp.ge.s32.totalorder %s20_s17, 6   ;;  %s1107_s13 = smov %s816_s14 }
 0x19a   : > { %s1108_s14 = smov %s910_s24  ;;  %s1109_s15 = smov %s824_s16 }
 0x19b   : > { %s1110_s16 = smov %s1112_s19  ;;  %19 = sbr.rel (!%p17_p12) target bundleno = 7 (0x7), region = 94 }
 0x1a2   :  { %416 = vsyncpa [#allocation4], 1 }
 0x1a3   :  { %418 = vsyncpa [#allocation4 + $0x1], 1 }
 0x1a4   :  { %419 = vsyncpa [#allocation7], 1 }
 0x1a5   :  { %421 = vsyncpa [#allocation7 + $0x1], 1 }
 0x1a6   :  { %422 = vsyncpa [#allocation5], 1 }
 0x1a7   :  { %424 = vsyncpa [#allocation5 + $0x1], 1 }

</bundles_post_ra>
